<compile_context>
chip_gen: v7x
topology: tpu7x:2x2x1
jax: 0.10.0
libtpu: 0.0.40
codegen_flags: <defaults>
</compile_context>

<pallas_src>
import functools

import jax
import jax.numpy as jnp
from jax.experimental import pallas as pl
from jax.experimental.pallas import tpu as pltpu


def _prm_kernel(x_ref, w_ref, mask_ref, o_ref, acc_ref, *,
                W, ks, n_c, use_mxu):
    """One image (grid axis 0) x one channel tile (grid axis 1).

    x_ref:    [Ct, HW]   input channel tile, flattened spatial dim in lanes
    w_ref:    [K8, Ct]   zero-padded 1x1-conv weight tile
    mask_ref: [1,  HW]   precomputed anchor-validity mask * 1/(Hout*Wout)
    o_ref:    [K8, 1]    per-image logits (bias added in the wrapper)
    acc_ref:  [K8, HW]   f32 conv-output accumulator (used when n_c > 1)
    """
    HW = x_ref.shape[-1]

    # ---- 1x1 conv partial sum for this channel tile ----
    if use_mxu:
        part = jnp.dot(w_ref[...], x_ref[...],
                       preferred_element_type=jnp.float32)
    else:
        # Tiny C / K: VPU broadcast multiply-adds; the MXU would be <2% utilized.
        Ct = w_ref.shape[1]
        x = x_ref[...].astype(jnp.float32)
        w = w_ref[...].astype(jnp.float32)
        part = w[:, 0:1] * x[0:1, :]
        for c in range(1, Ct):
            part = part + w[:, c:c + 1] * x[c:c + 1, :]

    def _pool_and_store(s):
        # MaxPool2d(ks, st), VALID, separable, on the flattened lane axis using
        # circular rolls (XLU slot, no unaligned-slice relayouts).
        # colmax[l] = max_{dj} s[l + dj]; wmax[l] = max_{di} colmax[l + di*W].
        colmax = s
        for dj in range(1, ks):
            colmax = jnp.maximum(colmax, pltpu.roll(s, shift=HW - dj, axis=1))
        wmax = colmax
        for di in range(1, ks):
            wmax = jnp.maximum(
                wmax, pltpu.roll(colmax, shift=HW - di * W, axis=1))
        # AdaptiveAvgPool2d(1): masked mean. The mask zeroes wrapped rows
        # (h > H-ks), row-crossing windows (w > W-ks) and non-stride anchors,
        # and already carries the 1/(Hout*Wout) scale.
        pooled = jnp.sum(wmax * mask_ref[...], axis=1, keepdims=True)  # [K8,1]
        o_ref[...] = pooled.astype(o_ref.dtype)

    if n_c == 1:
        _pool_and_store(part)                # no accumulator round-trip needed
    else:
        @pl.when(pl.program_id(1) == 0)
        def _():
            acc_ref[...] = jnp.zeros_like(acc_ref)

        acc_ref[...] += part

        @pl.when(pl.program_id(1) == n_c - 1)
        def _():
            _pool_and_store(acc_ref[...])


def prm_forward(x_nchw, weight, bias, *, prm_ks=3, prm_st=1,
                support_background=False):
    """x_nchw: [B, C, H, W]; weight: [K, C, 1, 1]; bias: [K] -> logits [B, K']."""
    B, C, H, W = x_nchw.shape
    K = weight.shape[0]
    assert H >= prm_ks and W >= prm_ks, (H, W, prm_ks)
    HW = H * W
    Hout = (H - prm_ks) // prm_st + 1
    Wout = (W - prm_ks) // prm_st + 1

    # Pad classes to the f32 sublane multiple (8): K lives in the sublane dim of
    # every intermediate, so padding to 128 would blow up VPU work / VMEM 16x.
    K8 = ((K + 7) // 8) * 8
    w_kc = weight.reshape(K, C).astype(x_nchw.dtype)
    w_pad = jnp.zeros((K8, C), dtype=w_kc.dtype).at[:K, :].set(w_kc)

    # Free view: NCHW stays in HBM, spatial dims merge into the lane axis.
    x_flat = x_nchw.reshape(B, C, HW)

    # Anchor-validity mask (depends only on the lane index), mean scale folded in.
    lin = jnp.arange(HW, dtype=jnp.int32)
    hcoord = lin // W
    wcoord = lin % W
    valid = (hcoord <= H - prm_ks) & (wcoord <= W - prm_ks)
    if prm_st > 1:
        valid = valid & (hcoord % prm_st == 0) & (wcoord % prm_st == 0)
    mask = (valid.astype(jnp.float32) / float(Hout * Wout)).reshape(1, HW)

    # Channel tiling for real backbone shapes (e.g. C=2048, 56x56) so the
    # double-buffered x blocks stay well inside scoped VMEM (v7x: 64 MiB total).
    if C % 128 == 0 and C > 512:
        Ct = next(ct for ct in (512, 384, 256, 128) if C % ct == 0)
    else:
        Ct = C
    nc = C // Ct
    use_mxu = C >= 128        # tiny C / K: broadcast-MACs beat an idle MXU

    kernel = functools.partial(_prm_kernel, W=W, ks=prm_ks, n_c=nc,
                               use_mxu=use_mxu)

    itemsize = jnp.dtype(x_flat.dtype).itemsize
    per_step_bytes = (2 * (Ct * HW * itemsize + K8 * Ct * itemsize
                           + HW * 4 + K8 * 4)
                      + K8 * HW * 4)
    cp = dict(dimension_semantics=("parallel", "arbitrary"))
    if per_step_bytes > (8 << 20):
        # v5e's default scoped VMEM is only 16 MiB; raise explicitly, w/ headroom.
        cp["vmem_limit_bytes"] = int(min(2 * per_step_bytes + (8 << 20), 96 << 20))

    out = pl.pallas_call(
        kernel,
        out_shape=jax.ShapeDtypeStruct((B, K8, 1), jnp.float32),
        grid_spec=pltpu.PrefetchScalarGridSpec(
            num_scalar_prefetch=0,
            # One image per step (>=2 batch steps engage both v7x TensorCores);
            # channel-reduction axis last, marked "arbitrary".
            grid=(B, nc),
            in_specs=[
                pl.BlockSpec((None, Ct, HW), lambda b, c: (b, c, 0)),
                pl.BlockSpec((K8, Ct), lambda b, c: (0, c)),
                pl.BlockSpec((1, HW), lambda b, c: (0, 0)),
            ],
            out_specs=pl.BlockSpec((None, K8, 1), lambda b, c: (b, 0, 0)),
            scratch_shapes=[pltpu.VMEM((K8, HW), jnp.float32)],
        ),
        compiler_params=pltpu.CompilerParams(**cp),
    )(x_flat, w_pad, mask)

    # Bias hoist: per-class constant commutes exactly with max-pool and mean.
    logits = out[:, :K, 0] + bias.astype(jnp.float32)[None, :]
    if support_background:
        logits = logits[:, 1:]   # correct_cl_logits
    return logits


def prm_reference(x_nchw, weight, bias, prm_ks, prm_st):
    """Pure-JAX reference for correctness checking."""
    K, C = weight.shape[0], weight.shape[1]
    s = jnp.einsum('bchw,kc->bkhw', x_nchw, weight.reshape(K, C))
    s = s + bias.reshape(1, K, 1, 1)
    pooled = jax.lax.reduce_window(
        s, -jnp.inf, jax.lax.max,
        window_dimensions=(1, 1, prm_ks, prm_ks),
        window_strides=(1, 1, prm_st, prm_st),
        padding='VALID')
    return jnp.mean(pooled, axis=(2, 3))


if __name__ == "__main__":
    # Module config (defaults: support_background=False, prm_ks=3, prm_st=1)
    B, C_in, H, W = 2, 4, 16, 16
    classes = 3
    prm_ks, prm_st = 3, 1

    key = jax.random.PRNGKey(0)
    kx, kw, kb = jax.random.split(key, 3)

    x = jax.random.normal(kx, (B, C_in, H, W), dtype=jnp.float32)
    # Deterministic synthetic Conv2d(in_channels, classes, kernel_size=1) params
    conv_w = jax.random.normal(kw, (classes, C_in, 1, 1), dtype=jnp.float32) * 0.1
    conv_b = jax.random.normal(kb, (classes,), dtype=jnp.float32) * 0.1

    logits = prm_forward(x, conv_w, conv_b, prm_ks=prm_ks, prm_st=prm_st,
                         support_background=False)
    logits = jax.block_until_ready(logits)

    ref = prm_reference(x, conv_w, conv_b, prm_ks, prm_st)
    assert logits.shape == (B, classes), logits.shape
    assert jnp.allclose(logits, ref, atol=1e-5, rtol=1e-5), (logits, ref)

    print("KERNEL_OK")
</pallas_src>

<mosaic_0001>
module attributes {stable_mosaic.version = 11 : i64} {
  func.func @_prm_kernel(%arg0: i32, %arg1: i32, %arg2: memref<1x4x256xf32, #tpu.memory_space<vmem>>, %arg3: memref<8x4xf32, #tpu.memory_space<vmem>>, %arg4: memref<1x256xf32, #tpu.memory_space<vmem>>, %arg5: memref<1x8x1xf32, #tpu.memory_space<vmem>>, %arg6: memref<8x256xf32, #tpu.memory_space<vmem>>) attributes {dimension_semantics = [#tpu.dimension_semantics<parallel>, #tpu.dimension_semantics<arbitrary>], iteration_bounds = array<i64: 2, 1>, scalar_prefetch = 0 : i64, scratch_operands = 1 : i64, tpu.core_type = #tpu.core_type<tc>, window_params = [{transform_indices = @transform_0, window_bounds = array<i64: 1, 4, 256>}, {transform_indices = @transform_1, window_bounds = array<i64: 8, 4>}, {pipeline_mode = #tpu.pipeline_mode<synchronous>, transform_indices = @transform_2, window_bounds = array<i64: 1, 256>}, {transform_indices = @transform_3, window_bounds = array<i64: 1, 8, 1>}]} {
    %c0 = arith.constant 0 : index
    %c0_0 = arith.constant 0 : index
    %c0_1 = arith.constant 0 : index
    %0 = vector.load %arg2[%c0, %c0_0, %c0_1] : memref<1x4x256xf32, #tpu.memory_space<vmem>>, vector<1x4x256xf32>
    %1 = vector.shape_cast %0 : vector<1x4x256xf32> to vector<4x256xf32>
    %c0_2 = arith.constant 0 : index
    %c0_3 = arith.constant 0 : index
    %2 = vector.load %arg3[%c0_2, %c0_3] : memref<8x4xf32, #tpu.memory_space<vmem>>, vector<8x4xf32>
    %3 = vector.extract_strided_slice %2 {offsets = [0, 0], sizes = [8, 1], strides = [1, 1]} : vector<8x4xf32> to vector<8x1xf32>
    %4 = vector.extract_strided_slice %1 {offsets = [0, 0], sizes = [1, 256], strides = [1, 1]} : vector<4x256xf32> to vector<1x256xf32>
    %5 = vector.broadcast %3 : vector<8x1xf32> to vector<8x256xf32>
    %6 = vector.broadcast %4 : vector<1x256xf32> to vector<8x256xf32>
    %7 = arith.mulf %5, %6 : vector<8x256xf32>
    %8 = vector.extract_strided_slice %2 {offsets = [0, 1], sizes = [8, 1], strides = [1, 1]} : vector<8x4xf32> to vector<8x1xf32>
    %9 = vector.extract_strided_slice %1 {offsets = [1, 0], sizes = [1, 256], strides = [1, 1]} : vector<4x256xf32> to vector<1x256xf32>
    %10 = vector.broadcast %8 : vector<8x1xf32> to vector<8x256xf32>
    %11 = vector.broadcast %9 : vector<1x256xf32> to vector<8x256xf32>
    %12 = arith.mulf %10, %11 : vector<8x256xf32>
    %13 = arith.addf %7, %12 : vector<8x256xf32>
    %14 = vector.extract_strided_slice %2 {offsets = [0, 2], sizes = [8, 1], strides = [1, 1]} : vector<8x4xf32> to vector<8x1xf32>
    %15 = vector.extract_strided_slice %1 {offsets = [2, 0], sizes = [1, 256], strides = [1, 1]} : vector<4x256xf32> to vector<1x256xf32>
    %16 = vector.broadcast %14 : vector<8x1xf32> to vector<8x256xf32>
    %17 = vector.broadcast %15 : vector<1x256xf32> to vector<8x256xf32>
    %18 = arith.mulf %16, %17 : vector<8x256xf32>
    %19 = arith.addf %13, %18 : vector<8x256xf32>
    %20 = vector.extract_strided_slice %2 {offsets = [0, 3], sizes = [8, 1], strides = [1, 1]} : vector<8x4xf32> to vector<8x1xf32>
    %21 = vector.extract_strided_slice %1 {offsets = [3, 0], sizes = [1, 256], strides = [1, 1]} : vector<4x256xf32> to vector<1x256xf32>
    %22 = vector.broadcast %20 : vector<8x1xf32> to vector<8x256xf32>
    %23 = vector.broadcast %21 : vector<1x256xf32> to vector<8x256xf32>
    %24 = arith.mulf %22, %23 : vector<8x256xf32>
    %25 = arith.addf %19, %24 : vector<8x256xf32>
    %c255_i32 = arith.constant 255 : i32
    %26 = tpu.dynamic_rotate %25 by %c255_i32 dim 1 : vector<8x256xf32>, i32 -> vector<8x256xf32>
    %27 = arith.maximumf %25, %26 : vector<8x256xf32>
    %c254_i32 = arith.constant 254 : i32
    %28 = tpu.dynamic_rotate %25 by %c254_i32 dim 1 : vector<8x256xf32>, i32 -> vector<8x256xf32>
    %29 = arith.maximumf %27, %28 : vector<8x256xf32>
    %c240_i32 = arith.constant 240 : i32
    %30 = tpu.dynamic_rotate %29 by %c240_i32 dim 1 : vector<8x256xf32>, i32 -> vector<8x256xf32>
    %31 = arith.maximumf %29, %30 : vector<8x256xf32>
    %c224_i32 = arith.constant 224 : i32
    %32 = tpu.dynamic_rotate %29 by %c224_i32 dim 1 : vector<8x256xf32>, i32 -> vector<8x256xf32>
    %33 = arith.maximumf %31, %32 : vector<8x256xf32>
    %c0_4 = arith.constant 0 : index
    %c0_5 = arith.constant 0 : index
    %34 = vector.load %arg4[%c0_4, %c0_5] : memref<1x256xf32, #tpu.memory_space<vmem>>, vector<1x256xf32>
    %35 = vector.broadcast %34 : vector<1x256xf32> to vector<8x256xf32>
    %36 = arith.mulf %33, %35 : vector<8x256xf32>
    %cst = arith.constant dense<0.000000e+00> : vector<8xf32>
    %37 = vector.multi_reduction <add>, %36, %cst [1] : vector<8x256xf32> to vector<8xf32>
    %38 = vector.shape_cast %37 : vector<8xf32> to vector<8x1xf32>
    %c0_6 = arith.constant 0 : index
    %c0_7 = arith.constant 0 : index
    %c0_8 = arith.constant 0 : index
    %39 = vector.load %arg5[%c0_6, %c0_7, %c0_8] : memref<1x8x1xf32, #tpu.memory_space<vmem>>, vector<1x8x1xf32>
    %40 = vector.shape_cast %39 : vector<1x8x1xf32> to vector<8x1xf32>
    %41 = vector.shape_cast %38 : vector<8x1xf32> to vector<1x8x1xf32>
    tpu.vector_store %arg5[%c0_6, %c0_7, %c0_8], %41 {strides = array<i32>} : memref<1x8x1xf32, #tpu.memory_space<vmem>>, vector<1x8x1xf32>,
    return
  }
  func.func @transform_0(%arg0: i32, %arg1: i32) -> (i32, i32, i32) {
    %c0_i32 = arith.constant 0 : i32
    %c0_i32_0 = arith.constant 0 : i32
    return %arg0, %arg1, %c0_i32 : i32, i32, i32
  }
  func.func @transform_1(%arg0: i32, %arg1: i32) -> (i32, i32) {
    %c0_i32 = arith.constant 0 : i32
    %c0_i32_0 = arith.constant 0 : i32
    return %c0_i32, %arg1 : i32, i32
  }
  func.func @transform_2(%arg0: i32, %arg1: i32) -> (i32, i32) {
    %c0_i32 = arith.constant 0 : i32
    %c0_i32_0 = arith.constant 0 : i32
    %c0_i32_1 = arith.constant 0 : i32
    return %c0_i32, %c0_i32_0 : i32, i32
  }
  func.func @transform_3(%arg0: i32, %arg1: i32) -> (i32, i32, i32) {
    %c0_i32 = arith.constant 0 : i32
    %c0_i32_0 = arith.constant 0 : i32
    %c0_i32_1 = arith.constant 0 : i32
    return %arg0, %c0_i32, %c0_i32_0 : i32, i32, i32
  }
}

</mosaic_0001>

<bundles_post_ra>
// kernel: tpu_custom_call.1
= control target key start
LH: loop header
LB: loop body
LE: loop exit
PB: predicated region body
PF: predicated region fallthrough
CT: control target
= control target key end

     0   :  { %8 = vsyncpa [#allocation4], 0  ;;  %s810_s0 = inlined_call_operand.hbm [shape: f32[2,4,256], index: 0, kind: input, shape index: {}]   ;;  %s811_s1 = inlined_call_operand.vmem [shape: f32[8,4], index: 1, kind: input, shape index: {}]   ;;  %s812_s2 = inlined_call_operand.vmem [shape: f32[1,256], index: 2, kind: input, shape index: {}]   ;;  %s813_s3 = inlined_call_operand.vmem [shape: f32[2,8,1], index: 3, kind: output, shape index: {}]  }
   0x1   :  { %10 = vsyncpa [#allocation4 + $0x1], 0  ;;  %s667_s12 = smov 0   ;;  %s669_s13 = smov 0  }
   0x2   :  { %s671_s14 = smov 0   ;;  %s673_s15 = smov 0  }
   0x3   :  { %s675_s16 = smov 0   ;;  %s677_s17 = smov 0  }
   0x4 LB: > { %s474_s18 = sadd.s32 4294967295, %s636_s17   ;;  %s28_s19 = sadd.s32 1, %s632_s16  ;;  %s636_s17 = sphi %s677_s17, %s16_s17   ;;  %s632_s16 = sphi %s675_s16, %s823_s16   ;;  %s628_s15 = sphi %s673_s15, %s822_s15   ;;  %s624_s14 = sphi %s671_s14, %s821_s14   ;;  %s620_s13 = sphi %s669_s13, %s820_s13   ;;  %s616_s12 = sphi %s667_s12, %s819_s12  }
   0x5   : > { %p30_p0 = scmp.ge.s32.totalorder %s28_s19, 2  ;;  %s37_s20 = sadd.s32 1, %s624_s14 }
   0x6   : > { %p44_p1 = scmp.ne.s32.totalorder %s624_s14, %s620_s13  ;;  %p45_p2 = scmp.eq.s32.totalorder %s636_s17, 0 }
   0x7   : > { %s825_s19 = smov (%p30_p0, %s28_s19), 0  ;;  %p50_p4 = scmp.ne.s32.totalorder %s620_s13, %s616_s12 }
   0x8   : > { %p703_p3 = por %p45_p2, %p44_p1  ;;  %s32_s22 = ssub.s32 %s632_s16, %s825_s19 }
   0x9   : > { %p51_p5 = scmp.eq.s32.totalorder %s474_s18, 0  ;;  %p35_p6 = scmp.eq.s32.totalorder %s32_s22, 0 }
   0xa   : > { %p494_p8 = scmp.lt.s32.totalorder %s636_s17, 2  ;;  %s157_s25 = sand.u32 1, %s624_s14  }
   0xb   : > { %p710_p7 = por %p51_p5, %p50_p4  ;;  %s487_s26 = sshll.u32 %s632_s16, 7 }
   0xc   : > { %s716_s24 = scalar_select %p35_p6, %s624_s14, %s37_s20  }
   0xd   : > { %s479_s27 = sshll.u32 %s157_s25, 3  ;;  %s723_s30 = scalar_lea.hbm %s810_s0, %s487_s26 }
   0xe   : > { %s161_s4 = scalar_lea.vmem [#allocation3], %s479_s27  ;;  %p727_p9 = pnand %p494_p8, %p703_p3 }
   0xf   : > { %s171_s5 = sshll.u32 %s161_s4, 4  ;;  %s158_s7 = scalar_lea.sflag [#allocation4], %s157_s25  ;;  %s731_s5 = int_to_ptr.vmem [resolvable:$true] %s171_s5 }
  0x10   : > { %s556_s8 = scalar_lea.hbm %s723_s30, 128  ;;  %p558_p13 = pneg %p727_p9 }
  0x11   : > { %p557_p12 = scmp.ne.s32.totalorder %s723_s30, %s556_s8  ;;  %s561_s11 = scalar_lea.hbm %s810_s0, 256 }
  0x12   : > { %p562_p2 = scmp.lt.u32.totalorder %s723_s30, %s810_s0  ;;  %p563_p3 = scmp.lt.u32.totalorder %s561_s11, %s556_s8 }
  0x13   : > { %p559_p0 = pnand %p558_p13, %p557_p12  ;;  %p565_p5 = scmp.lt.u32.totalorder %s556_s8, %s723_s30 }
  0x14   : > { %p564_p4 = por %p563_p3, %p562_p2 }
  0x15   : > { %p560_p1 = pneg %p559_p0 }
  0x16   : > { %p566_p6 = por %p565_p5, %p564_p4 }
  0x18   : > { %p567_p8 = pnand %p566_p6, %p560_p1 }
  0x1a   : > { %570 = shalt.err (!%p567_p8)
}
  0x1b   : > { %s571_s20 = scalar_lea.vmem %s731_s5, 128  ;;  %s638_s21 = smov [#allocation3]  }
  0x1c   : > { %p572_p12 = scmp.ne.s32.totalorder %s731_s5, %s571_s20  ;;  %s576_s22 = sshll.u32 %s638_s21, 4  ;;  %s577_s22 = int_to_ptr.vmem [resolvable:$false] %s576_s22 }
  0x1d   : > { %s578_s25 = scalar_lea.vmem %s577_s22, 256  ;;  %p579_p11 = scmp.lt.s32.totalorder %s731_s5, %s577_s22 }
  0x1e   : > { %p574_p0 = pnand %p572_p12, %p558_p13  ;;  %p580_p2 = scmp.lt.s32.totalorder %s578_s25, %s571_s20 }
  0x20   : > { %p575_p10 = pneg %p574_p0  ;;  %p581_p3 = por %p580_p2, %p579_p11 }
  0x22   : > { %p582_p4 = pnand %p581_p3, %p575_p10 }
  0x24   : > { %585 = shalt.err (!%p582_p4)
}
  0x25   : > { %493 = dma.hbm_to_vmem [thread:$0]  (!%p727_p9), %s723_s30, 128, %s731_s5, %s158_s7  }
  0x26   : > { %p817_p1 = scmp.lt.s32.totalorder %s636_s17, 3  ;;  %p818_p5 = scmp.ge.s32.totalorder %s636_s17, 1 }
  0x28   : > { %p177_p13 = pnand %p818_p5, %p817_p1 }
  0x29   : > { %s182_s26 = sand.u32 (!%p177_p13), 1, %s620_s13  }
  0x2a   : > { %180 = sbr.rel (%p177_p13) target bundleno = 584 (0x248), region = 32  ;;  %s483_s27 = sshll.u32 (!%p177_p13), %s182_s26, 3 }
  0x2b   : > { %s183_s28 = scalar_lea.sflag (!%p177_p13), [#allocation4], %s182_s26  ;;  %s186_s29 = scalar_lea.vmem (!%p177_p13), [#allocation3], %s483_s27 }
  0x31   : > { %611 = dma.done.wait (%p710_p7), %s183_s28, 128  }
  0x32   : > { %613 = vsyncadd (%p710_p7), %s183_s28, 4294967168  ;;  %v639_v0 = vmov 0   ;;  %v640_v1 = vmov 2   ;;  %v221_v2 = vld [vmem:[%s811_s1] sm:$0xff]  ;;  %v641_v3 = vmov 1   ;;  %v642_v4 = vmov 3  }
  0x33   : > { %551 = vset.pattern.permute.xlu0 %v639_v0  ;;  %553 = vset.pattern.permute.xlu1 %v640_v1  ;;  %v228_v5 = vlaneseq  ;;  %v220_v11 = vld [vmem:[%s186_s29] sm:$0xff]  ;;  %s643_s23 = smov 127   ;;  %s644_s5 = smov 126   ;;  %vm381_vm4 = vcmask 7168  }
  0x34   : > { %224 = vperm.xlu0 %551, %v221_v2   ;;  %275 = vperm.xlu1 %553, %v221_v2   ;;  %s645_s6 = smov 112   ;;  %s646_s7 = smov 96  }
  0x35   : > { %v229_v6 = vshrl.u32 %v228_v5, 7  ;;  %v331_v50 = vand.u32 127, %v228_v5  ;;  %p216_p7 = scmp.lt.s32.totalorder %s628_s15, 1 }
  0x37   : > { %v772_v7 = vsub.s32 0, %v229_v6  ;;  %v234_v8 = vsub.s32 4, %v229_v6  ;;  %v774_v9 = vsub.s32 1, %v229_v6  ;;  %v258_v10 = vsub.s32 5, %v229_v6  ;;  %s827_s15 = smov (!%p216_p7, %s628_s15), 1 }
  0x38   : > { %552 = vset.pattern.permute.xlu0 %v641_v3  ;;  %554 = vset.pattern.permute.xlu1 %v642_v4  ;;  %v280_v12 = vsub.s32 2, %v229_v6  ;;  %v284_v13 = vsub.s32 6, %v229_v6  ;;  %v306_v14 = vsub.s32 3, %v229_v6  ;;  %v310_v15 = vsub.s32 7, %v229_v6  ;;  %v364_v3 = vld [vmem:[%s812_s2] sm:$0x3] }
  0x39   : > { %249 = vperm.xlu0 %552, %v221_v2   ;;  %301 = vperm.xlu1 %554, %v221_v2   ;;  %v231_v16 = vrot.slane %v220_v11, %v772_v7  ;;  %v235_v17 = vrot.slane %v220_v11, %v234_v8  ;;  %v255_v18 = vrot.slane %v220_v11, %v774_v9  ;;  %vm332_vm0 = vcmp.lt.s32.totalorder %v331_v50, 127  ;;  %s484_s10 = sshll.u32 %s827_s15, 3 }
  0x3a   : > { %v259_v19 = vrot.slane %v220_v11, %v258_v10  ;;  %v281_v20 = vrot.slane %v220_v11, %v280_v12  ;;  %v285_v21 = vrot.slane %v220_v11, %v284_v13  ;;  %v307_v24 = vrot.slane %v220_v11, %v306_v14  ;;  %s219_s18 = scalar_lea.vmem %s813_s3, %s484_s10 }
  0x3b   : > { %v311_v25 = vrot.slane %v220_v11, %v310_v15  ;;  %v241_v26 = vrot.slane %v231_v16, %v772_v7  ;;  %v245_v27 = vrot.slane %v235_v17, %v772_v7  ;;  %v265_v28 = vrot.slane %v255_v18, %v774_v9 }
  0x3c   : > { %v269_v29 = vrot.slane %v259_v19, %v774_v9  ;;  %v291_v30 = vrot.slane %v281_v20, %v280_v12  ;;  %v295_v31 = vrot.slane %v285_v21, %v280_v12  ;;  %v317_v32 = vrot.slane %v307_v24, %v306_v14 }
  0x3d   : > { %555 = vset.pattern.permute.xlu0 %v642_v4  ;;  %v321_v33 = vrot.slane %v311_v25, %v306_v14  ;;  %vm341_vm1 = vcmp.lt.s32.totalorder %v331_v50, 126  ;;  %vm350_vm2 = vcmp.lt.s32.totalorder %v331_v50, 112  ;;  %vm359_vm3 = vcmp.lt.s32.totalorder %v331_v50, 96 }
  0x3e   : > { %v369_v10 = vrot.slane %v364_v3, %v772_v7  ;;  %v373_v11 = vrot.slane %v364_v3, %v774_v9 }
  0xb3   : > { %v225_v22 = vpop.permute.xlu0 %224  ;;  %v276_v23 = vpop.permute.xlu1 %275 }
  0xb4   : > { %v246_v36 = vmul.f32 %v241_v26, %v225_v22  ;;  %v247_v37 = vmul.f32 %v245_v27, %v225_v22  ;;  %v296_v40 = vmul.f32 %v291_v30, %v276_v23  ;;  %v297_v41 = vmul.f32 %v295_v31, %v276_v23 }
  0xb8   : > { %v250_v34 = vpop.permute.xlu0 %249  ;;  %v302_v35 = vpop.permute.xlu1 %301 }
  0xb9   : > { %v270_v38 = vmul.f32 %v265_v28, %v250_v34  ;;  %v271_v39 = vmul.f32 %v269_v29, %v250_v34  ;;  %v322_v44 = vmul.f32 %v317_v32, %v302_v35  ;;  %v323_v45 = vmul.f32 %v321_v33, %v302_v35 }
  0xbb   : > { %v272_v42 = vadd.f32 %v270_v38, %v246_v36  ;;  %v273_v43 = vadd.f32 %v271_v39, %v247_v37 }
  0xbd   : > { %v298_v46 = vadd.f32 %v296_v40, %v272_v42  ;;  %v299_v47 = vadd.f32 %v297_v41, %v273_v43 }
  0xbf   : > { %v324_v48 = vadd.f32 %v322_v44, %v298_v46  ;;  %v325_v49 = vadd.f32 %v323_v45, %v299_v47 }
  0xc1   : > { %328 = vrot.lane.b32.xlu0 %v325_v49, %s643_s23  ;;  %326 = vrot.lane.b32.xlu1 %v324_v48, %s643_s23 }
  0xc5   : > { %339 = vrot.lane.b32.xlu0 %v325_v49, %s644_s5  ;;  %337 = vrot.lane.b32.xlu1 %v324_v48, %s644_s5 }
 0x133   : > { %v329_v51 = vpop.permute.xlu0 %328  ;;  %v327_v52 = vpop.permute.xlu1 %326 }
 0x134   : > { %v333_v53 = vsel %vm332_vm0, %v327_v52, %v329_v51  ;;  %v334_v54 = vsel %vm332_vm0, %v329_v51, %v327_v52 }
 0x135   : > { %v335_v55 = vmax.f32 %v324_v48, %v333_v53  ;;  %v336_v56 = vmax.f32 %v325_v49, %v334_v54 }
 0x137   : > { %v340_v57 = vpop.permute.xlu0 %339  ;;  %v338_v58 = vpop.permute.xlu1 %337 }
 0x138   : > { %v342_v59 = vsel %vm341_vm1, %v338_v58, %v340_v57  ;;  %v343_v60 = vsel %vm341_vm1, %v340_v57, %v338_v58 }
 0x139   : > { %v344_v61 = vmax.f32 %v335_v55, %v342_v59  ;;  %v345_v62 = vmax.f32 %v336_v56, %v343_v60 }
 0x13b   : > { %348 = vrot.lane.b32.xlu0 %v345_v62, %s645_s6  ;;  %346 = vrot.lane.b32.xlu1 %v344_v61, %s645_s6 }
 0x13f   : > { %357 = vrot.lane.b32.xlu0 %v345_v62, %s646_s7  ;;  %355 = vrot.lane.b32.xlu1 %v344_v61, %s646_s7 }
 0x1ad   : > { %v349_v63 = vpop.permute.xlu0 %348  ;;  %v347_v0 = vpop.permute.xlu1 %346 }
 0x1ae   : > { %v351_v1 = vsel %vm350_vm2, %v347_v0, %v349_v63  ;;  %v352_v2 = vsel %vm350_vm2, %v349_v63, %v347_v0 }
 0x1af   : > { %v353_v4 = vmax.f32 %v344_v61, %v351_v1  ;;  %v354_v5 = vmax.f32 %v345_v62, %v352_v2 }
 0x1b1   : > { %v358_v6 = vpop.permute.xlu0 %357  ;;  %v356_v8 = vpop.permute.xlu1 %355 }
 0x1b2   : > { %v360_v12 = vsel %vm359_vm3, %v356_v8, %v358_v6  ;;  %v361_v13 = vsel %vm359_vm3, %v358_v6, %v356_v8 }
 0x1b3   : > { %v362_v14 = vmax.f32 %v353_v4, %v360_v12  ;;  %v363_v15 = vmax.f32 %v354_v5, %v361_v13 }
 0x1b5   : > { %v376_v16 = vmul.f32 %v369_v10, %v362_v14  ;;  %v377_v17 = vmul.f32 %v373_v11, %v363_v15 }
 0x1b7   : > { %v378_v18 = vadd.f32 %v377_v17, %v376_v16 }
 0x1b9   : > { %379 = vadd.xlane.f32.xlu1 %v378_v18 }
 0x246   : > { %v380_v19 = vpop.xlane.xlu1 %379 }
 0x247   : > { %382 = vst.msk [vmem:[%s219_s18] sm:$0xff] %vm381_vm4, %v380_v19 }
 0x248 PF: > { %s16_s17 = sadd.s32 1, %s636_s17   ;;  %s819_s12 = smov %s620_s13 }
 0x249   : > { %p13_p9 = scmp.ge.s32.totalorder %s16_s17, 4   ;;  %s820_s13 = smov %s624_s14 }
 0x24a   : > { %s821_s14 = smov %s716_s24  ;;  %s822_s15 = smov %s632_s16 }
 0x24b   : > { %s823_s16 = smov %s825_s19  ;;  %15 = sbr.rel (!%p13_p9) target bundleno = 4 (0x4), region = 75 }
 0x252   :  { %402 = vsyncpa [#allocation4], 1 }
 0x253   :  { %404 = vsyncpa [#allocation4 + $0x1], 1 }

</bundles_post_ra>
